<compile_context>
chip_gen: v7x
topology: tpu7x:2x2x1
jax: 0.10.0
libtpu: 0.0.40
codegen_flags: <defaults>
</compile_context>

<pallas_src>
import math

import jax
import jax.numpy as jnp
from jax.experimental import pallas as pl
from jax.experimental.pallas import tpu as pltpu


def _whole_array_dma_kernel(x_hbm_ref, o_hbm_ref):
    """Single HBM->HBM DMA covering the whole (already flattened) array."""

    def body(sem):
        cp = pltpu.make_async_copy(x_hbm_ref, o_hbm_ref, sem)
        cp.start()
        cp.wait()

    pl.run_scoped(body, pltpu.SemaphoreType.DMA)


def _make_chunked_dma_kernel(num_chunks: int, chunk_rows: int):
    """HBM->HBM copy split into `num_chunks` concurrent row-chunk DMAs."""

    def kernel(x_hbm_ref, o_hbm_ref):
        def body(sems):
            copies = []
            # Start every DMA first (all in flight), then wait on all of them,
            # so several DMA engines stream concurrently for large inputs.
            for c in range(num_chunks):
                rows = pl.ds(c * chunk_rows, chunk_rows)
                cp = pltpu.make_async_copy(
                    x_hbm_ref.at[rows], o_hbm_ref.at[rows], sems.at[c]
                )
                cp.start()
                copies.append(cp)
            for cp in copies:
                cp.wait()

        pl.run_scoped(body, pltpu.SemaphoreType.DMA((num_chunks,)))

    return kernel


def flatten(x, *, max_inflight_dmas: int = 4):
    """Pallas equivalent of `x.view(x.size(0), -1)` (row-major flatten)."""
    n = x.shape[0]
    d = int(math.prod(x.shape[1:])) if x.ndim > 1 else 1
    # Row-major reshape == torch .view element order; metadata-only in XLA.
    x2d = x.reshape(n, d)

    # Chunk the row axis only when each chunk stays a multiple of 8 rows
    # (sublane-tile aligned => each DMA moves contiguous, unpadded tile spans).
    # Small batches (e.g. n=2) fall back to one whole-array DMA.
    num_chunks = 1
    for k in range(min(max_inflight_dmas, n), 1, -1):
        if n % k == 0 and (n // k) % 8 == 0:
            num_chunks = k
            break
    chunk_rows = n // num_chunks

    if num_chunks == 1:
        kernel = _whole_array_dma_kernel
    else:
        kernel = _make_chunked_dma_kernel(num_chunks, chunk_rows)

    return pl.pallas_call(
        kernel,
        out_shape=jax.ShapeDtypeStruct((n, d), x.dtype),
        in_specs=[pl.BlockSpec(memory_space=pl.ANY)],
        out_specs=pl.BlockSpec(memory_space=pl.ANY),
    )(x2d)


if __name__ == "__main__":
    key = jax.random.PRNGKey(0)
    k1, k2, k3 = jax.random.split(key, 3)

    # Small shapes consistent with the module: batch=2, channels=4, spatial=16.
    x = jax.random.normal(k1, (2, 4, 16, 16), dtype=jnp.float32)
    out = jax.jit(flatten)(x)
    jax.block_until_ready(out)
    assert out.shape == (2, 4 * 16 * 16)
    assert bool(jnp.array_equal(out, x.reshape(2, -1)))

    # Ragged flattened size (not a multiple of 128): the DMA path has no
    # (8,128) block constraint, so the same kernel handles it.
    y = jax.random.normal(k2, (2, 3, 5, 7), dtype=jnp.float32)
    out2 = jax.jit(flatten)(y)
    jax.block_until_ready(out2)
    assert out2.shape == (2, 3 * 5 * 7)
    assert bool(jnp.array_equal(out2, y.reshape(2, -1)))

    # Larger batch exercises the multi-DMA (chunked, tile-aligned) path.
    z = jax.random.normal(k3, (32, 8, 4, 8), dtype=jnp.float32)
    out3 = jax.jit(flatten)(z)
    jax.block_until_ready(out3)
    assert out3.shape == (32, 8 * 4 * 8)
    assert bool(jnp.array_equal(out3, z.reshape(32, -1)))

    print("KERNEL_OK")
</pallas_src>

<mosaic_0001>
module attributes {stable_mosaic.version = 11 : i64} {
  func.func @_whole_array_dma_kernel(%arg0: memref<2x1024xf32, #tpu.memory_space<any>>, %arg1: memref<2x1024xf32, #tpu.memory_space<any>>) attributes {dimension_semantics = [], scalar_prefetch = 0 : i64, scratch_operands = 0 : i64, tpu.core_type = #tpu.core_type<tc>} {
    "tpu.region"() ({
      %0 = tpu.sem_alloc : memref<!tpu.dma_semaphore, #tpu.memory_space<semaphore_mem>>
      tpu.enqueue_dma source(%arg0 : memref<2x1024xf32, #tpu.memory_space<any>>) target(%arg1 : memref<2x1024xf32, #tpu.memory_space<any>>) target_semaphore(%0 : memref<!tpu.dma_semaphore, #tpu.memory_space<semaphore_mem>>)
      tpu.wait_dma2 semaphore(%0 : memref<!tpu.dma_semaphore, #tpu.memory_space<semaphore_mem>>) src(%arg0 : memref<2x1024xf32, #tpu.memory_space<any>>) dst(%arg1 : memref<2x1024xf32, #tpu.memory_space<any>>)
      tpu.yield
    }) : () -> ()
    return
  }
}

</mosaic_0001>

<bundles_post_ra>
// kernel: flatten.1
= control target key start
LH: loop header
LB: loop body
LE: loop exit
PB: predicated region body
PF: predicated region fallthrough
CT: control target
= control target key end

     0   :  { %s70_s0 = inlined_call_operand.vmem [shape: f32[2,1024], index: 0, kind: input, shape index: {}]   ;;  %s71_s1 = inlined_call_operand.hbm [shape: f32[2,1024], index: 1, kind: output, shape index: {}]  }
   0x1   :  { %s13_s8 = sshll.u32 %s70_s0, 4  ;;  %s14_s8 = int_to_ptr.vmem [resolvable:$true] %s13_s8 }
   0x2   :  { %s21_s9 = scalar_lea.vmem %s14_s8, 256  ;;  %p26_p1 = scmp.lt.s32.totalorder %s14_s8, %s14_s8 }
   0x3   :  { %p22_p0 = scmp.ne.s32.totalorder %s14_s8, %s21_s9  ;;  %p27_p2 = scmp.lt.s32.totalorder %s21_s9, %s21_s9 }
   0x5   :  { %p28_p3 = por %p27_p2, %p26_p1 }
   0x7   :  { %p29_p4 = pnand %p28_p3, %p22_p0 }
   0x9   :  { %32 = shalt.err (!%p29_p4)  }
   0xa   :  { %s33_s12 = scalar_lea.hbm %s71_s1, 256 }
   0xb   :  { %p34_p5 = scmp.ne.s32.totalorder %s71_s1, %s33_s12  ;;  %p37_p6 = scmp.lt.u32.totalorder %s33_s12, %s71_s1 }
   0xd   :  { %p39_p7 = pnand %p37_p6, %p34_p5 }
   0xf   :  { %42 = shalt.err (!%p39_p7)  }
  0x10   :  { %16 = dma.vmem_to_hbm [thread:$0]  %s14_s8, 256, %s71_s1, [#allocation2] }
  0x11   :  { %43 = dma.done.wait [#allocation2], 256 }
  0x12   :  { %44 = vsyncadd [#allocation2], 4294967040 }

</bundles_post_ra>
